<compile_context>
chip_gen: v6e
topology: v6e:2x2x1
jax: 0.10.0
libtpu: 0.0.40
codegen_flags: <defaults>
</compile_context>

<pallas_src>
import jax
import jax.numpy as jnp
from jax.experimental import pallas as pl
from jax.experimental.pallas import tpu as pltpu


def _round_up(a: int, m: int) -> int:
    return (a + m - 1) // m * m


# ---------------------------------------------------------------------------
# General (two-stage) kernel: keeps the module's kernel_vals -> weighted-sum
# structure so a different (elementwise-composable) SVM kernel could be
# swapped in by editing the `kv = ...` line.
# ---------------------------------------------------------------------------
def _svm_general_kernel(bias_ref, x_ref, sv_ref, w_ref, out_ref, acc_ref):
    # bias_ref: (1,)      SMEM f32
    # x_ref:    (tb, D)   VMEM, native dtype (bf16/f32)
    # sv_ref:   (tn, D)   VMEM, native dtype
    # w_ref:    (1, tn)   VMEM f32 (lane-dense weight row)
    # out_ref:  (tb, 1)   VMEM f32
    # acc_ref:  (tb, 1)   VMEM f32 scratch accumulator
    n = pl.program_id(1)

    @pl.when(n == 0)
    def _():
        acc_ref[...] = jnp.zeros_like(acc_ref)

    # kernel_vals tile: x @ sv^T on the MXU, f32 accumulation, operands kept
    # in their native dtype (no upcast).
    kv = jax.lax.dot_general(
        x_ref[...], sv_ref[...],
        dimension_numbers=(((1,), (1,)), ((), ())),
        preferred_element_type=jnp.float32,
    )  # (tb, tn) f32

    # Weighted reduce against the lane-dense weight row: VPU multiply + XLU
    # lane reduction (both units idle while the MXU runs the next tile).
    acc_ref[...] += jnp.sum(kv * w_ref[...], axis=-1, keepdims=True)

    @pl.when(n == pl.num_programs(1) - 1)
    def _():
        out_ref[...] = (acc_ref[...] + bias_ref[0]).astype(out_ref.dtype)


def base_svm_forward(x, support_vectors, weight, bias, *, tb=128, tn=256):
    """Pallas BaseSVM.forward with a linear kernel (general two-stage form).

    x:               (B, D)
    support_vectors: (N, D)
    weight:          (N,)
    bias:            (1,)
    returns:         (B,) float32
    """
    B, D = x.shape
    N, D2 = support_vectors.shape
    assert D == D2

    tb = min(tb, _round_up(B, 8))
    tn = min(tn, _round_up(N, 128))
    B_pad = _round_up(B, tb)
    N_pad = _round_up(N, tn)

    if B_pad != B:
        x = jnp.pad(x, ((0, B_pad - B), (0, 0)))
    if N_pad != N:
        support_vectors = jnp.pad(support_vectors, ((0, N_pad - N), (0, 0)))
    # Lane-dense (1, N) weight row in f32 (zero-padded: padded SVs contribute 0).
    w_row = jnp.pad(weight.astype(jnp.float32), (0, N_pad - N)).reshape(1, N_pad)
    bias1 = bias.astype(jnp.float32).reshape(1)

    itemsize = x.dtype.itemsize
    cost = pl.CostEstimate(
        flops=2 * B_pad * N_pad * D + 2 * B_pad * N_pad,
        transcendentals=0,
        bytes_accessed=(B_pad * D + N_pad * D) * itemsize + N_pad * 4 + B_pad * 4 + 4,
    )

    out = pl.pallas_call(
        _svm_general_kernel,
        out_shape=jax.ShapeDtypeStruct((B_pad, 1), jnp.float32),
        grid=(B_pad // tb, N_pad // tn),
        in_specs=[
            pl.BlockSpec(memory_space=pltpu.MemorySpace.SMEM),   # bias
            pl.BlockSpec((tb, D), lambda i, n: (i, 0)),          # x
            pl.BlockSpec((tn, D), lambda i, n: (n, 0)),          # support_vectors
            pl.BlockSpec((1, tn), lambda i, n: (0, n)),          # weight row
        ],
        out_specs=pl.BlockSpec((tb, 1), lambda i, n: (i, 0)),
        scratch_shapes=[pltpu.VMEM((tb, 1), jnp.float32)],
        compiler_params=pltpu.CompilerParams(
            dimension_semantics=("parallel", "arbitrary")),
        cost_estimate=cost,
    )(bias1, x, support_vectors, w_row)

    return out[:B, 0]


# ---------------------------------------------------------------------------
# Fused linear-kernel path: out = x @ (sv^T @ w) + b.
# Valid only because the kernel is the linear one.
# ---------------------------------------------------------------------------
def _svm_linear_fused_kernel(bias_ref, x_ref, v_ref, out_ref):
    # x_ref: (tb, D) native dtype; v_ref: (1, D) f32; out_ref: (tb, 1) f32.
    xf = x_ref[...].astype(jnp.float32)
    out = jnp.sum(xf * v_ref[...], axis=-1, keepdims=True) + bias_ref[0]
    out_ref[...] = out.astype(out_ref.dtype)


def base_svm_forward_linear_fused(x, support_vectors, weight, bias, *, tb=128):
    B, D = x.shape
    # v = sv^T @ w computed once in the wrapper (O(N*D), f32).
    v = jnp.einsum(
        "nd,n->d",
        support_vectors.astype(jnp.float32),
        weight.astype(jnp.float32),
        precision=jax.lax.Precision.HIGHEST,
    ).reshape(1, D)

    tb = min(tb, _round_up(B, 8))
    B_pad = _round_up(B, tb)
    if B_pad != B:
        x = jnp.pad(x, ((0, B_pad - B), (0, 0)))
    bias1 = bias.astype(jnp.float32).reshape(1)

    cost = pl.CostEstimate(
        flops=2 * B_pad * D,
        transcendentals=0,
        bytes_accessed=B_pad * D * x.dtype.itemsize + D * 4 + B_pad * 4 + 4,
    )

    out = pl.pallas_call(
        _svm_linear_fused_kernel,
        out_shape=jax.ShapeDtypeStruct((B_pad, 1), jnp.float32),
        grid=(B_pad // tb,),
        in_specs=[
            pl.BlockSpec(memory_space=pltpu.MemorySpace.SMEM),   # bias
            pl.BlockSpec((tb, D), lambda i: (i, 0)),             # x
            pl.BlockSpec((1, D), lambda i: (0, 0)),              # v = sv^T w
        ],
        out_specs=pl.BlockSpec((tb, 1), lambda i: (i, 0)),
        compiler_params=pltpu.CompilerParams(dimension_semantics=("parallel",)),
        cost_estimate=cost,
    )(bias1, x, v)

    return out[:B, 0]


def reference_forward(x, support_vectors, weight, bias):
    xf = x.astype(jnp.float32)
    svf = support_vectors.astype(jnp.float32)
    kv = jnp.dot(xf, svf.T, precision=jax.lax.Precision.HIGHEST)
    return jnp.dot(kv, weight.astype(jnp.float32),
                   precision=jax.lax.Precision.HIGHEST) + bias


if __name__ == "__main__":
    key = jax.random.PRNGKey(0)
    k_x, k_sv, k_w, k_b = jax.random.split(key, 4)

    # Small demo shapes that still exercise a real (2 x 2) grid with
    # accumulation over support-vector tiles.
    B, D = 128, 128        # batch of query points, feature dim
    num_samples = 512      # number of support vectors

    # Native bf16 activations / support vectors (full-rate MXU path),
    # f32 parameters as in the PyTorch module.
    x = jax.random.normal(k_x, (B, D), dtype=jnp.float32).astype(jnp.bfloat16)
    support_vectors = jax.random.normal(
        k_sv, (num_samples, D), dtype=jnp.float32).astype(jnp.bfloat16)
    weight = 0.01 * jax.random.normal(k_w, (num_samples,), dtype=jnp.float32)
    bias = 0.1 * jax.random.normal(k_b, (1,), dtype=jnp.float32)

    ref = reference_forward(x, support_vectors, weight, bias)

    out = base_svm_forward(x, support_vectors, weight, bias, tb=64, tn=256)
    out = jax.block_until_ready(out)
    assert out.shape == (B,)
    assert jnp.allclose(out, ref, atol=2e-3, rtol=2e-3), (out, ref)

    out_fused = base_svm_forward_linear_fused(x, support_vectors, weight, bias,
                                              tb=64)
    out_fused = jax.block_until_ready(out_fused)
    assert out_fused.shape == (B,)
    assert jnp.allclose(out_fused, ref, atol=2e-3, rtol=2e-3), (out_fused, ref)

    print("KERNEL_OK")
</pallas_src>

<mosaic_0001>
module attributes {stable_mosaic.version = 11 : i64} {
  func.func @_svm_general_kernel(%arg0: i32, %arg1: i32, %arg2: memref<1xf32, #tpu.memory_space<smem>>, %arg3: memref<64x128xbf16, #tpu.memory_space<vmem>>, %arg4: memref<256x128xbf16, #tpu.memory_space<vmem>>, %arg5: memref<1x256xf32, #tpu.memory_space<vmem>>, %arg6: memref<64x1xf32, #tpu.memory_space<vmem>>, %arg7: memref<64x1xf32, #tpu.memory_space<vmem>>) attributes {dimension_semantics = [#tpu.dimension_semantics<parallel>, #tpu.dimension_semantics<arbitrary>], iteration_bounds = array<i64: 2, 2>, scalar_prefetch = 0 : i64, scratch_operands = 1 : i64, tpu.core_type = #tpu.core_type<tc>, window_params = [{transform_indices = @transform_0, window_bounds = array<i64: 1>}, {transform_indices = @transform_1, window_bounds = array<i64: 64, 128>}, {transform_indices = @transform_2, window_bounds = array<i64: 256, 128>}, {transform_indices = @transform_3, window_bounds = array<i64: 1, 256>}, {transform_indices = @transform_4, window_bounds = array<i64: 64, 1>}]} {
    %c0_i32 = arith.constant 0 : i32
    %0 = arith.cmpi eq, %arg1, %c0_i32 : i32
    %1 = arith.extui %0 : i1 to i32
    %c0_i32_0 = arith.constant 0 : i32
    %2 = arith.cmpi ne, %1, %c0_i32_0 : i32
    scf.if %2 {
      %cst_12 = arith.constant 0.000000e+00 : f32
      %17 = vector.broadcast %cst_12 : f32 to vector<64x1xf32>
      %c0_13 = arith.constant 0 : index
      %c0_14 = arith.constant 0 : index
      %18 = vector.load %arg7[%c0_13, %c0_14] : memref<64x1xf32, #tpu.memory_space<vmem>>, vector<64x1xf32>
      tpu.vector_store %arg7[%c0_13, %c0_14], %17 {strides = array<i32>} : memref<64x1xf32, #tpu.memory_space<vmem>>, vector<64x1xf32>,
    } else {
    }
    %c0 = arith.constant 0 : index
    %c0_1 = arith.constant 0 : index
    %3 = vector.load %arg3[%c0, %c0_1] : memref<64x128xbf16, #tpu.memory_space<vmem>>, vector<64x128xbf16>
    %c0_2 = arith.constant 0 : index
    %c0_3 = arith.constant 0 : index
    %4 = vector.load %arg4[%c0_2, %c0_3] : memref<256x128xbf16, #tpu.memory_space<vmem>>, vector<256x128xbf16>
    %cst = arith.constant dense<0.000000e+00> : vector<64x256xf32>
    %5 = tpu.matmul %3, %4, %cst {dimension_numbers = #tpu.dot_dimension_numbers<[1], [1], [0], [0], [0, 0, 1, 0], [], []>} : vector<64x128xbf16>, vector<256x128xbf16>, vector<64x256xf32> -> vector<64x256xf32>
    %c0_4 = arith.constant 0 : index
    %c0_5 = arith.constant 0 : index
    %6 = vector.load %arg7[%c0_4, %c0_5] : memref<64x1xf32, #tpu.memory_space<vmem>>, vector<64x1xf32>
    %c0_6 = arith.constant 0 : index
    %c0_7 = arith.constant 0 : index
    %7 = vector.load %arg5[%c0_6, %c0_7] : memref<1x256xf32, #tpu.memory_space<vmem>>, vector<1x256xf32>
    %8 = vector.broadcast %7 : vector<1x256xf32> to vector<64x256xf32>
    %9 = arith.mulf %5, %8 : vector<64x256xf32>
    %cst_8 = arith.constant dense<0.000000e+00> : vector<64xf32>
    %10 = vector.multi_reduction <add>, %9, %cst_8 [1] : vector<64x256xf32> to vector<64xf32>
    %11 = vector.shape_cast %10 : vector<64xf32> to vector<64x1xf32>
    %12 = arith.addf %6, %11 : vector<64x1xf32>
    %c0_9 = arith.constant 0 : index
    %c0_10 = arith.constant 0 : index
    %13 = vector.load %arg7[%c0_9, %c0_10] : memref<64x1xf32, #tpu.memory_space<vmem>>, vector<64x1xf32>
    tpu.vector_store %arg7[%c0_9, %c0_10], %12 {strides = array<i32>} : memref<64x1xf32, #tpu.memory_space<vmem>>, vector<64x1xf32>,
    %c1_i32 = arith.constant 1 : i32
    %14 = arith.cmpi eq, %arg1, %c1_i32 : i32
    %15 = arith.extui %14 : i1 to i32
    %c0_i32_11 = arith.constant 0 : i32
    %16 = arith.cmpi ne, %15, %c0_i32_11 : i32
    scf.if %16 {
      %c0_12 = arith.constant 0 : index
      %c0_13 = arith.constant 0 : index
      %17 = vector.load %arg7[%c0_12, %c0_13] : memref<64x1xf32, #tpu.memory_space<vmem>>, vector<64x1xf32>
      %c0_14 = arith.constant 0 : index
      %18 = memref.load %arg2[%c0_14] : memref<1xf32, #tpu.memory_space<smem>>
      %19 = vector.broadcast %18 : f32 to vector<64x1xf32>
      %20 = arith.addf %17, %19 : vector<64x1xf32>
      %c0_15 = arith.constant 0 : index
      %c0_16 = arith.constant 0 : index
      %21 = vector.load %arg6[%c0_15, %c0_16] : memref<64x1xf32, #tpu.memory_space<vmem>>, vector<64x1xf32>
      tpu.vector_store %arg6[%c0_15, %c0_16], %20 {strides = array<i32>} : memref<64x1xf32, #tpu.memory_space<vmem>>, vector<64x1xf32>,
    } else {
    }
    return
  }
  func.func @transform_0(%arg0: i32, %arg1: i32) -> i32 {
    %c0_i32 = arith.constant 0 : i32
    %c0_i32_0 = arith.constant 0 : i32
    return %c0_i32 : i32
  }
  func.func @transform_1(%arg0: i32, %arg1: i32) -> (i32, i32) {
    %c0_i32 = arith.constant 0 : i32
    %c0_i32_0 = arith.constant 0 : i32
    return %arg0, %c0_i32 : i32, i32
  }
  func.func @transform_2(%arg0: i32, %arg1: i32) -> (i32, i32) {
    %c0_i32 = arith.constant 0 : i32
    %c0_i32_0 = arith.constant 0 : i32
    return %arg1, %c0_i32 : i32, i32
  }
  func.func @transform_3(%arg0: i32, %arg1: i32) -> (i32, i32) {
    %c0_i32 = arith.constant 0 : i32
    %c0_i32_0 = arith.constant 0 : i32
    return %c0_i32, %arg1 : i32, i32
  }
  func.func @transform_4(%arg0: i32, %arg1: i32) -> (i32, i32) {
    %c0_i32 = arith.constant 0 : i32
    %c0_i32_0 = arith.constant 0 : i32
    return %arg0, %c0_i32 : i32, i32
  }
}

</mosaic_0001>

<bundles_post_ra>
// kernel: tpu_custom_call.1
= control target key start
LH: loop header
LB: loop body
LE: loop exit
PB: predicated region body
PF: predicated region fallthrough
CT: control target
= control target key end

     0   :  { %s1415_s0 = inlined_call_operand.<no memory space> [shape: f32[1], index: 0, kind: input, shape index: {}]   ;;  %s1416_s1 = inlined_call_operand.hbm [shape: bf16[128,128], index: 1, kind: input, shape index: {}]   ;;  %s1417_s2 = inlined_call_operand.hbm [shape: bf16[512,128], index: 2, kind: input, shape index: {}]   ;;  %s1418_s3 = inlined_call_operand.vmem [shape: f32[1,512], index: 3, kind: input, shape index: {}]   ;;  %s1419_s4 = inlined_call_operand.vmem [shape: f32[128,1], index: 4, kind: output, shape index: {}]  }
   0x1   :  { %1423 = sst [smem:[#allocation11_spill]] %s1416_s1 }
   0x2   :  { %9 = sst [smem:[#allocation3]] %s1415_s0 }
   0x3   :  { %10 = vsyncpa [#allocation5], 0 }
   0x4   :  { %12 = vsyncpa [#allocation5 + $0x1], 0 }
   0x5   :  { %13 = vsyncpa [#allocation7], 0 }
   0x6   :  { %15 = vsyncpa [#allocation7 + $0x1], 0  ;;  %s1148_s17 = smov 0   ;;  %s1150_s18 = smov 0  }
   0x7   :  { %s1152_s19 = smov 0   ;;  %s1154_s20 = smov 0  }
   0x8   :  { %s1156_s21 = smov 0   ;;  %s1158_s22 = smov 0  }
   0x9   :  { %s1160_s23 = smov 0   ;;  %s1162_s24 = smov 0  }
   0xa   :  { %s1164_s0 = smov 0   ;;  %s1166_s25 = smov 0  }
   0xb   :  { %s1168_s26 = smov 0  }
   0xc LB: > { %s758_s27 = sadd.s32 4294967295, %s1113_s26   ;;  %s33_s28 = sadd.s32 1, %s1109_s25  ;;  %s1113_s26 = sphi %s1168_s26, %s21_s26   ;;  %s1109_s25 = sphi %s1166_s25, %s1445_s25   ;;  %s1105_s0 = sphi %s1164_s0, %s1444_s0   ;;  %s1101_s24 = sphi %s1162_s24, %s1443_s24   ;;  %s1097_s23 = sphi %s1160_s23, %s1442_s23   ;;  %s1093_s22 = sphi %s1158_s22, %s1441_s22   ;;  %s1089_s21 = sphi %s1156_s21, %s1440_s21   ;;  %s1085_s20 = sphi %s1154_s20, %s1439_s20   ;;  %s1081_s19 = sphi %s1152_s19, %s1438_s19   ;;  %s1077_s18 = sphi %s1150_s18, %s1437_s18   ;;  %s1073_s17 = sphi %s1148_s17, %s1436_s17  }
   0xd   : > { %p68_p0 = scmp.ne.s32.totalorder %s1093_s22, %s1089_s21  ;;  %p69_p1 = scmp.eq.s32.totalorder %s1113_s26, 0 }
   0xe   : > { %p74_p2 = scmp.ne.s32.totalorder %s1089_s21, %s1085_s20  ;;  %p1207_p3 = scmp.eq.s32.totalorder %s758_s27, 0 }
   0xf   : > { %p70_p4 = por %p69_p1, %p68_p0  ;;  %p851_p5 = scmp.lt.s32.totalorder %s1113_s26, 4 }
  0x10   : > { %p1216_p6 = por %p1207_p3, %p74_p2  ;;  %s179_s5 = sand.u32 1, %s1093_s22  }
  0x11   : > { %s762_s6 = sshll.u32 %s179_s5, 5  ;;  %s798_s7 = sshll.u32 %s1109_s25, 9 }
  0x12   : > { %s1426_s1 = sld [smem:[#allocation11_spill]]  ;;  %s183_s11 = scalar_lea.vmem [#allocation4], %s762_s6 }
  0x13   : > { %s190_s12 = sshll.u32 %s183_s11, 4  ;;  %p1227_p7 = pnand %p851_p5, %p70_p4  ;;  %s191_s12 = int_to_ptr.vmem [resolvable:$true] %s190_s12 }
  0x14   : > { %p768_p8 = scmp.ge.s32.totalorder %s1113_s26, 1  ;;  %s180_s14 = scalar_lea.sflag [#allocation5], %s179_s5 }
  0x15   : > { %p965_p9 = pneg %p1227_p7  ;;  %s976_s15 = scalar_lea.vmem %s191_s12, 512 }
  0x16   : > { %p977_p10 = scmp.ne.s32.totalorder %s191_s12, %s976_s15  ;;  %s1115_s16 = smov [#allocation4]  }
  0x17   : > { %s981_s20 = sshll.u32 %s1115_s16, 4  ;;  %s982_s20 = int_to_ptr.vmem [resolvable:$false] %s981_s20 }
  0x18   : > { %s189_s10 = scalar_lea.hbm %s1426_s1, %s798_s7  ;;  %p979_p11 = pnand %p977_p10, %p965_p9 }
  0x19   : > { %s983_s27 = scalar_lea.vmem %s982_s20, 1024  ;;  %p984_p13 = scmp.lt.s32.totalorder %s191_s12, %s982_s20 }
  0x1a   : > { %p980_p12 = pneg %p979_p11  ;;  %p985_p0 = scmp.lt.s32.totalorder %s983_s27, %s976_s15 }
  0x1c   : > { %p986_p2 = por %p985_p0, %p984_p13 }
  0x1e   : > { %p987_p4 = pnand %p986_p2, %p980_p12 }
  0x20   : > { %990 = shalt.err (!%p987_p4)
}
  0x21   : > { %s1420_s6 = smov 64   ;;  %s1421_s5 = smov 4  }
  0x22   : > { %847 = dma.hbm_to_vmem [thread:$0]  (!%p1227_p7), %s189_s10, 512, %s191_s12, %s180_s14, %s1420_s6, %s1420_s6, %s1421_s5  }
  0x23   : > { %p227_p9 = scmp.lt.s32.totalorder %s1113_s26, 5  ;;  %s61_s8 = sadd.s32 1, %s1093_s22 }
  0x24   : > { %s30_s9 = sadd.s32 1, %s1105_s0  ;;  %s87_s11 = sadd.s32 1, %s1081_s19 }
  0x25   : > { %p1242_p10 = pnand %p768_p8, %p227_p9  ;;  %p31_p11 = scmp.ge.s32.totalorder %s30_s9, 2 }
  0x26   : > { %p94_p12 = scmp.ne.s32.totalorder %s1081_s19, %s1077_s18  ;;  %p100_p13 = scmp.ne.s32.totalorder %s1077_s18, %s1073_s17 }
  0x27   : > { %s1447_s9 = smov (%p31_p11, %s30_s9), 0  ;;  %s1449_s28 = smov (!%p31_p11, %s33_s28), %s1109_s25 }
  0x28   : > { %1429 = sst [smem:[#allocation10_spill]] %s1447_s9  ;;  %s84_s10 = ssub.s32 %s1105_s0, %s1447_s9 }
  0x29   : > { %s200_s12 = sand.u32 1, %s1081_s19   ;;  %p35_p7 = scmp.ge.s32.totalorder %s1449_s28, 2 }
  0x2a   : > { %p85_p8 = scmp.eq.s32.totalorder %s84_s10, 0  ;;  %p1263_p0 = por %p94_p12, %p69_p1 }
  0x2b   : > { %p1269_p2 = por %p100_p13, %p1207_p3  ;;  %s1451_s28 = smov (%p35_p7, %s1449_s28), 0 }
  0x2c   : > { %s1276_s14 = scalar_select %p85_p8, %s1081_s19, %s87_s11  }
  0x2d   : > { %s58_s15 = ssub.s32 %s1109_s25, %s1451_s28  ;;  %s765_s16 = sshll.u32 %s200_s12, 7 }
  0x2e   : > { %p59_p4 = scmp.eq.s32.totalorder %s58_s15, 0  ;;  %s799_s20 = sshll.u32 %s1105_s0, 11 }
  0x2f   : > { %s204_s27 = scalar_lea.vmem [#allocation6], %s765_s16  ;;  %s210_s1 = scalar_lea.hbm %s1417_s2, %s799_s20 }
  0x30   : > { %s211_s10 = sshll.u32 %s204_s27, 4  ;;  %p1291_p1 = pnand %p851_p5, %p1263_p0  ;;  %s212_s10 = int_to_ptr.vmem [resolvable:$true] %s211_s10 }
  0x31   : > { %s1282_s6 = scalar_select %p59_p4, %s1093_s22, %s61_s8  }
  0x32   : > { %s201_s11 = scalar_lea.sflag [#allocation7], %s200_s12  ;;  %p993_p3 = pneg %p1291_p1 }
  0x33   : > { %s1004_s15 = scalar_lea.vmem %s212_s10, 2048  ;;  %s1118_s8 = smov [#allocation6]  }
  0x34   : > { %p1005_p9 = scmp.ne.s32.totalorder %s212_s10, %s1004_s15  ;;  %s1009_s16 = sshll.u32 %s1118_s8, 4  ;;  %s1010_s16 = int_to_ptr.vmem [resolvable:$false] %s1009_s16 }
  0x35   : > { %s1011_s5 = scalar_lea.vmem %s1010_s16, 4096  ;;  %p1012_p13 = scmp.lt.s32.totalorder %s212_s10, %s1010_s16 }
  0x36   : > { %p1007_p11 = pnand %p1005_p9, %p993_p3  ;;  %p1013_p7 = scmp.lt.s32.totalorder %s1011_s5, %s1004_s15 }
  0x38   : > { %p1008_p12 = pneg %p1007_p11  ;;  %p1014_p8 = por %p1013_p7, %p1012_p13 }
  0x3a   : > { %p1015_p4 = pnand %p1014_p8, %p1008_p12 }
  0x3c   : > { %1018 = shalt.err (!%p1015_p4)
}
  0x3d   : > { %s1433_s13 = smov 4   ;;  %s1434_s20 = smov 64  }
  0x3e   : > { %850 = dma.hbm_to_vmem [thread:$0]  (!%p1291_p1), %s210_s1, 2048, %s212_s10, %s201_s11, %s1434_s20, %s1434_s20, %s1433_s13  }
  0x3f   : > { %231 = sbr.rel (%p1242_p10) target bundleno = 519 (0x207), region = 36  ;;  %s233_s12 = sand.u32 (!%p1242_p10), 1, %s1089_s21  }
  0x40   : > { %s769_s27 = sshll.u32 (!%p1242_p10), %s233_s12, 5  ;;  %s234_s29 = scalar_lea.sflag (!%p1242_p10), [#allocation5], %s233_s12 }
  0x41   : > { %s1305_s8 = scalar_lea.vmem (!%p1242_p10), [#allocation4], %s769_s27 }
  0x44   : > { %1064 = dma.done.wait (%p1216_p6), %s234_s29, 512  }
  0x45   : > { %1066 = vsyncadd (%p1216_p6), %s234_s29, 4294966784  ;;  %s242_s9 = sand.u32 1, %s1077_s18  }
  0x46   : > { %s770_s15 = sshll.u32 %s242_s9, 7  ;;  %s243_s1 = scalar_lea.sflag [#allocation7], %s242_s9 }
  0x47   : > { %s1312_s10 = scalar_lea.vmem [#allocation6], %s770_s15 }
  0x48   : > { %1068 = dma.done.wait (%p1269_p2), %s243_s1, 2048  }
  0x49   : > { %1070 = vsyncadd (%p1269_p2), %s243_s1, 4294965248  ;;  %s771_s7 = sshll.u32 %s1097_s23, 1  ;;  %s772_s11 = sshll.u32 %s1101_s24, 3 }
  0x4a   : > { %p283_p5 = scmp.lt.s32.totalorder %s771_s7, 3  ;;  %p288_p10 = scmp.lt.s32.totalorder %s772_s11, 15 }
  0x4b   : > { %p774_p6 = scmp.ne.s32.totalorder %s1097_s23, 0 }
  0x4c   : > { %s1453_s7 = smov (!%p283_p5, %s771_s7), 3  ;;  %s1455_s11 = smov (!%p288_p10, %s772_s11), 15 }
  0x4d   : > { %s285_s5 = scalar_lea.vmem %s1418_s3, %s1453_s7  ;;  %s773_s13 = sshll.u32 %s1455_s11, 3 }
  0x4e   : > { %s1329_s17 = scalar_lea.vmem %s1419_s4, %s773_s13  ;;  %297 = sbr.rel (%p774_p6) target bundleno = 88 (0x58), region = 48 }
  0x53   : > { %vm298_vm0 = vcmask 7168   ;;  %v1119_v0 = vmov 0.0  }
  0x54   : > { %299 = vst.msk [vmem:[#allocation2] sm:$0xff] %vm298_vm0, %v1119_v0  ;;  %300 = vst.msk [vmem:[#allocation2 + $0x8] sm:$0xff] %vm298_vm0, %v1119_v0 }
  0x55   : > { %301 = vst.msk [vmem:[#allocation2 + $0x10] sm:$0xff] %vm298_vm0, %v1119_v0  ;;  %302 = vst.msk [vmem:[#allocation2 + $0x18] sm:$0xff] %vm298_vm0, %v1119_v0 }
  0x56   : > { %303 = vst.msk [vmem:[#allocation2 + $0x20] sm:$0xff] %vm298_vm0, %v1119_v0  ;;  %304 = vst.msk [vmem:[#allocation2 + $0x28] sm:$0xff] %vm298_vm0, %v1119_v0 }
  0x57   : > { %305 = vst.msk [vmem:[#allocation2 + $0x30] sm:$0xff] %vm298_vm0, %v1119_v0  ;;  %306 = vst.msk [vmem:[#allocation2 + $0x38] sm:$0xff] %vm298_vm0, %v1119_v0 }
  0x58 PF: > { %v943_v1 = vld [vmem:[%s1312_s10 + $0x78] sm:$0xff]   ;;  %v945_v3 = vld [vmem:[%s1312_s10 + $0x70] sm:$0xff]   ;;  %v947_v5 = vld [vmem:[%s1312_s10 + $0x68] sm:$0xff]   ;;  %v550_v21 = vlaneseq  ;;  %vm608_vm1 = vcmask 7168   ;;  %p795_p0 = scmp.ne.s32.totalorder %s1097_s23, 1 }
  0x59   : > { %v944_v2 = vld [vmem:[%s1312_s10 + $0x38] sm:$0xff]   ;;  %800 = vmatprep.subr.bf16.mxu0 %v943_v1  ;;  %824 = vmatprep.subr.bf16.mxu1 %v943_v1  ;;  %v946_v4 = vld [vmem:[%s1312_s10 + $0x30] sm:$0xff]   ;;  %v948_v6 = vld [vmem:[%s1312_s10 + $0x28] sm:$0xff]   ;;  %s629_s29 = sld [smem:[#allocation3]] (!%p795_p0) }
  0x5a   : > { %801 = vmatpush3.bf16.xpose.msra.mxu0 %v944_v2  ;;  %832 = vmatpush3.bf16.xpose.msra.mxu1 %v944_v2  ;;  %v949_v7 = vld [vmem:[%s1312_s10 + $0x60] sm:$0xff]   ;;  %v960_v9 = vld [vmem:[%s1305_s8 + $0x10] sm:$0xff]   ;;  %v951_v11 = vld [vmem:[%s1312_s10 + $0x58] sm:$0xff]   ;;  %v551_v22 = vshrl.u32 %v550_v21, 7 }
  0x5b   : > { %802 = vmatprep.subr.bf16.mxu0 %v945_v3  ;;  %825 = vmatprep.subr.bf16.mxu1 %v945_v3  ;;  %v959_v8 = vld [vmem:[%s1305_s8] sm:$0xff]   ;;  %v952_v12 = vld [vmem:[%s1312_s10 + $0x18] sm:$0xff]   ;;  %v953_v13 = vld [vmem:[%s1312_s10 + $0x50] sm:$0xff]  }
  0x5c   : > { %816 = vmatprep.mubr.bf16.mxu0 %v959_v8  ;;  %820 = vmatprep.mubr.bf16.mxu1 %v960_v9  ;;  %v950_v10 = vld [vmem:[%s1312_s10 + $0x20] sm:$0xff]   ;;  %v954_v14 = vld [vmem:[%s1312_s10 + $0x10] sm:$0xff]   ;;  %v955_v15 = vld [vmem:[%s1312_s10 + $0x48] sm:$0xff]   ;;  %v552_v23 = vsub.s32 0, %v551_v22  ;;  %v556_v24 = vsub.s32 1, %v551_v22 }
  0x5d   : > { %v956_v16 = vld [vmem:[%s1312_s10 + $0x8] sm:$0xff]   ;;  %v957_v17 = vld [vmem:[%s1312_s10 + $0x40] sm:$0xff]   ;;  %v962_v20 = vld [vmem:[%s1305_s8 + $0x18] sm:$0xff]  }
  0x5e   : > { %v958_v18 = vld [vmem:[%s1312_s10] sm:$0xff]   ;;  %v961_v19 = vld [vmem:[%s1305_s8 + $0x8] sm:$0xff]  }
  0x5f   : > { %v548_v25 = vld [vmem:[%s285_s5] sm:$0x3] }
  0x60   : > { %v553_v26 = vrot.slane %v548_v25, %v552_v23  ;;  %v557_v27 = vrot.slane %v548_v25, %v556_v24  ;;  %v547_v25 = vld [vmem:[#allocation2 + $0x38] sm:$0xff] }
  0x62   : > { %803 = vmatpush3.bf16.xpose.msra.mxu0 %v946_v4  ;;  %833 = vmatpush3.bf16.xpose.msra.mxu1 %v946_v4  ;;  %v540_v4 = vld [vmem:[#allocation2] sm:$0xff] }
  0x63   : > { %804 = vmatprep.subr.bf16.mxu0 %v947_v5  ;;  %826 = vmatprep.subr.bf16.mxu1 %v947_v5 }
  0x6a   : > { %805 = vmatpush3.bf16.xpose.msra.mxu0 %v948_v6  ;;  %834 = vmatpush3.bf16.xpose.msra.mxu1 %v948_v6 }
  0x6b   : > { %806 = vmatprep.subr.bf16.mxu0 %v949_v7  ;;  %827 = vmatprep.subr.bf16.mxu1 %v949_v7  ;;  %v545_v7 = vld [vmem:[#allocation2 + $0x28] sm:$0xff] }
  0x72   : > { %807 = vmatpush3.bf16.xpose.msra.mxu0 %v950_v10  ;;  %835 = vmatpush3.bf16.xpose.msra.mxu1 %v950_v10 }
  0x73   : > { %808 = vmatprep.subr.bf16.mxu0 %v951_v11  ;;  %828 = vmatprep.subr.bf16.mxu1 %v951_v11 }
  0x7a   : > { %809 = vmatpush3.bf16.xpose.msra.mxu0 %v952_v12  ;;  %836 = vmatpush3.bf16.xpose.msra.mxu1 %v952_v12 }
  0x7b   : > { %810 = vmatprep.subr.bf16.mxu0 %v953_v13  ;;  %829 = vmatprep.subr.bf16.mxu1 %v953_v13  ;;  %v541_v13 = vld [vmem:[#allocation2 + $0x8] sm:$0xff] }
  0x82   : > { %811 = vmatpush3.bf16.xpose.msra.mxu0 %v954_v14  ;;  %837 = vmatpush3.bf16.xpose.msra.mxu1 %v954_v14  ;;  %v542_v14 = vld [vmem:[#allocation2 + $0x10] sm:$0xff] }
  0x83   : > { %812 = vmatprep.subr.bf16.mxu0 %v955_v15  ;;  %830 = vmatprep.subr.bf16.mxu1 %v955_v15 }
  0x8a   : > { %813 = vmatpush3.bf16.xpose.msra.mxu0 %v956_v16  ;;  %838 = vmatpush3.bf16.xpose.msra.mxu1 %v956_v16 }
  0x8b   : > { %814 = vmatprep.subr.bf16.mxu0 %v957_v17  ;;  %831 = vmatprep.subr.bf16.mxu1 %v957_v17 }
  0x92   : > { %815 = vmatpush3.bf16.xpose.msra.mxu0 %v958_v18  ;;  %839 = vmatpush3.bf16.xpose.msra.mxu1 %v958_v18 }
  0x99   : > { %817 = vmatmul.mubr.bf16.vlgmr.msra.gmra.mxu0 %v959_v8  ;;  %821 = vmatmul.mubr.bf16.vlgmr.msra.gmra.mxu1 %v960_v9  ;;  %v544_v8 = vld [vmem:[#allocation2 + $0x20] sm:$0xff] }
  0x9a   : > { %818 = vmatprep.mubr.bf16.mxu0 %v961_v19  ;;  %822 = vmatprep.mubr.bf16.mxu1 %v962_v20 }
  0xa1   : > { %819 = vmatmul.mubr.bf16.gmra.mxu0 %v961_v19  ;;  %823 = vmatmul.mubr.bf16.gmra.mxu1 %v962_v20  ;;  %v546_v19 = vld [vmem:[#allocation2 + $0x30] sm:$0xff]  ;;  %v543_v20 = vld [vmem:[#allocation2 + $0x18] sm:$0xff] }
 0x159   : > { %v501_v28 = vpop.f32.mrf.mxu0  ;;  %v521_v29 = vpop.f32.mrf.mxu1 }
 0x15a   : > { %v560_v32 = vmul.f32 %v553_v26, %v501_v28  ;;  %v568_v40 = vmul.f32 %v553_v26, %v521_v29 }
 0x15b   : > { %v503_v30 = vpop.f32.mrf.mxu0  ;;  %v523_v31 = vpop.f32.mrf.mxu1 }
 0x15c   : > { %v561_v33 = vmul.f32 %v557_v27, %v503_v30  ;;  %v569_v36 = vmul.f32 %v557_v27, %v523_v31 }
 0x15d   : > { %v505_v34 = vpop.f32.mrf.mxu0  ;;  %v525_v35 = vpop.f32.mrf.mxu1 }
 0x15e   : > { %v576_v37 = vadd.f32 %v561_v33, %v560_v32  ;;  %v570_v41 = vmul.f32 %v553_v26, %v525_v35  ;;  %v588_v47 = vadd.f32 %v569_v36, %v568_v40  ;;  %v562_v50 = vmul.f32 %v553_v26, %v505_v34 }
 0x15f   : > { %v507_v38 = vpop.f32.mrf.mxu0  ;;  %v527_v39 = vpop.f32.mrf.mxu1 }
 0x160   : > { %v571_v42 = vmul.f32 %v557_v27, %v527_v39  ;;  %577 = vadd.xlane.f32.xlu0 %v576_v37  ;;  %v563_v45 = vmul.f32 %v557_v27, %v507_v38 }
 0x161   : > { %v511_v43 = vpop.f32.mrf.mxu0  ;;  %v531_v44 = vpop.f32.mrf.mxu1 }
 0x162   : > { %v591_v46 = vadd.f32 %v571_v42, %v570_v41  ;;  %v564_v51 = vmul.f32 %v553_v26, %v511_v43  ;;  %v572_v55 = vmul.f32 %v553_v26, %v531_v44  ;;  %v579_v57 = vadd.f32 %v563_v45, %v562_v50 }
 0x163   : > { %v513_v48 = vpop.f32.mrf.mxu0  ;;  %v533_v49 = vpop.f32.mrf.mxu1 }
 0x164   : > { %v565_v52 = vmul.f32 %v557_v27, %v513_v48  ;;  %592 = vadd.xlane.f32.xlu1 %v591_v46  ;;  %589 = vadd.xlane.f32.xlu0 %v588_v47  ;;  %v573_v56 = vmul.f32 %v557_v27, %v533_v49 }
 0x165   : > { %v515_v53 = vpop.f32.mrf.mxu0  ;;  %v535_v54 = vpop.f32.mrf.mxu1 }
 0x166   : > { %v582_v58 = vadd.f32 %v565_v52, %v564_v51  ;;  %v566_v61 = vmul.f32 %v553_v26, %v515_v53  ;;  %v594_v0 = vadd.f32 %v573_v56, %v572_v55  ;;  %v574_v2 = vmul.f32 %v553_v26, %v535_v54 }
 0x167   : > { %v517_v59 = vpop.f32.mrf.mxu0  ;;  %v537_v60 = vpop.f32.mrf.mxu1 }
 0x168   : > { %v567_v62 = vmul.f32 %v557_v27, %v517_v59  ;;  %580 = vadd.xlane.f32.xlu0 %v579_v57  ;;  %583 = vadd.xlane.f32.xlu1 %v582_v58  ;;  %v575_v63 = vmul.f32 %v557_v27, %v537_v60 }
 0x16a   : > { %v585_v1 = vadd.f32 %v567_v62, %v566_v61  ;;  %v597_v3 = vadd.f32 %v575_v63, %v574_v2 }
 0x16c   : > { %595 = vadd.xlane.f32.xlu0 %v594_v0  ;;  %586 = vadd.xlane.f32.xlu1 %v585_v1 }
 0x170   : > { %598 = vadd.xlane.f32.xlu1 %v597_v3 }
 0x1e9   : > { %v578_v5 = vpop.xlane.xlu0 %577 }
 0x1ea   : > { %v600_v6 = vadd.f32 %v578_v5, %v540_v4 }
 0x1ec   : > { %609 = vst.msk [vmem:[#allocation2] sm:$0xff] %vm608_vm1, %v600_v6 }
 0x1ed   : > { %v593_v9 = vpop.xlane.xlu1 %592  ;;  %v590_v10 = vpop.xlane.xlu0 %589 }
 0x1ee   : > { %v605_v11 = vadd.f32 %v593_v9, %v545_v7  ;;  %v604_v12 = vadd.f32 %v590_v10, %v544_v8 }
 0x1f0   : > { %614 = vst.msk [vmem:[#allocation2 + $0x28] sm:$0xff] %vm608_vm1, %v605_v11  ;;  %613 = vst.msk [vmem:[#allocation2 + $0x20] sm:$0xff] %vm608_vm1, %v604_v12 }
 0x1f1   : > { %v581_v15 = vpop.xlane.xlu0 %580  ;;  %v584_v16 = vpop.xlane.xlu1 %583 }
 0x1f2   : > { %v601_v17 = vadd.f32 %v581_v15, %v541_v13  ;;  %v602_v18 = vadd.f32 %v584_v16, %v542_v14 }
 0x1f4   : > { %610 = vst.msk [vmem:[#allocation2 + $0x8] sm:$0xff] %vm608_vm1, %v601_v17  ;;  %611 = vst.msk [vmem:[#allocation2 + $0x10] sm:$0xff] %vm608_vm1, %v602_v18 }
 0x1f5   : > { %v596_v21 = vpop.xlane.xlu0 %595  ;;  %v587_v22 = vpop.xlane.xlu1 %586 }
 0x1f6   : > { %v606_v23 = vadd.f32 %v596_v21, %v546_v19  ;;  %v603_v24 = vadd.f32 %v587_v22, %v543_v20 }
 0x1f8   : > { %615 = vst.msk [vmem:[#allocation2 + $0x30] sm:$0xff] %vm608_vm1, %v606_v23  ;;  %612 = vst.msk [vmem:[#allocation2 + $0x18] sm:$0xff] %vm608_vm1, %v603_v24  ;;  %620 = sbr.rel (%p795_p0) target bundleno = 519 (0x207), region = 52 }
 0x1f9   : > { %v599_v26 = vpop.xlane.xlu1 %598 }
 0x1fa   : > { %v607_v27 = vadd.f32 %v599_v26, %v547_v25 }
 0x1fc   : > { %616 = vst.msk [vmem:[#allocation2 + $0x38] sm:$0xff] %vm608_vm1, %v607_v27 }
 0x1fd   : > { %v621_v28 = vld [vmem:[#allocation2] sm:$0xff]  ;;  %v622_v29 = vld [vmem:[#allocation2 + $0x8] sm:$0xff]  ;;  %v623_v30 = vld [vmem:[#allocation2 + $0x10] sm:$0xff]  ;;  %v630_v36 = vstv %s629_s29 }
 0x1fe   : > { %v625_v32 = vld [vmem:[#allocation2 + $0x20] sm:$0xff]  ;;  %v626_v33 = vld [vmem:[#allocation2 + $0x28] sm:$0xff]  ;;  %v631_v37 = vadd.f32 %v630_v36, %v621_v28  ;;  %v632_v38 = vadd.f32 %v630_v36, %v622_v29  ;;  %v633_v39 = vadd.f32 %v630_v36, %v623_v30 }
 0x1ff   : > { %v624_v31 = vld [vmem:[#allocation2 + $0x18] sm:$0xff]  ;;  %v627_v34 = vld [vmem:[#allocation2 + $0x30] sm:$0xff]  ;;  %v635_v41 = vadd.f32 %v630_v36, %v625_v32  ;;  %v636_v42 = vadd.f32 %v630_v36, %v626_v33 }
 0x200   : > { %v634_v40 = vadd.f32 %v630_v36, %v624_v31  ;;  %v637_v43 = vadd.f32 %v630_v36, %v627_v34  ;;  %639 = vst.msk [vmem:[%s1329_s17] sm:$0xff] %vm608_vm1, %v631_v37  ;;  %640 = vst.msk [vmem:[%s1329_s17 + $0x8] sm:$0xff] %vm608_vm1, %v632_v38 }
 0x201   : > { %641 = vst.msk [vmem:[%s1329_s17 + $0x10] sm:$0xff] %vm608_vm1, %v633_v39  ;;  %643 = vst.msk [vmem:[%s1329_s17 + $0x20] sm:$0xff] %vm608_vm1, %v635_v41 }
 0x202   : > { %642 = vst.msk [vmem:[%s1329_s17 + $0x18] sm:$0xff] %vm608_vm1, %v634_v40  ;;  %644 = vst.msk [vmem:[%s1329_s17 + $0x28] sm:$0xff] %vm608_vm1, %v636_v42 }
 0x203   : > { %v628_v35 = vld [vmem:[#allocation2 + $0x38] sm:$0xff]  ;;  %645 = vst.msk [vmem:[%s1329_s17 + $0x30] sm:$0xff] %vm608_vm1, %v637_v43 }
 0x204   : > { %v638_v44 = vadd.f32 %v630_v36, %v628_v35 }
 0x206   : > { %646 = vst.msk [vmem:[%s1329_s17 + $0x38] sm:$0xff] %vm608_vm1, %v638_v44 }
 0x207 PF: > { %s21_s26 = sadd.s32 1, %s1113_s26   ;;  %s1435_s8 = sld [smem:[#allocation10_spill]] }
 0x208   : > { %p18_p2 = scmp.ge.s32.totalorder %s21_s26, 6   ;;  %s1436_s17 = smov %s1077_s18 }
 0x209   : > { %s1437_s18 = smov %s1081_s19  ;;  %s1438_s19 = smov %s1276_s14 }
 0x20a   : > { %s1439_s20 = smov %s1089_s21  ;;  %s1440_s21 = smov %s1093_s22 }
 0x20b   : > { %s1441_s22 = smov %s1282_s6  ;;  %s1442_s23 = smov %s1105_s0 }
 0x20c   : > { %s1443_s24 = smov %s1109_s25  ;;  %s1445_s25 = smov %s1451_s28 }
 0x20d   : > { %s1444_s0 = smov %s1435_s8  ;;  %20 = sbr.rel (!%p18_p2) target bundleno = 12 (0xc), region = 100 }
 0x212   :  { %669 = vsyncpa [#allocation5], 1 }
 0x213   :  { %671 = vsyncpa [#allocation5 + $0x1], 1 }
 0x214   :  { %672 = vsyncpa [#allocation7], 1 }
 0x215   :  { %674 = vsyncpa [#allocation7 + $0x1], 1 }

</bundles_post_ra>
